<compile_context>
chip_gen: v7x
topology: tpu7x:2x2x1
jax: 0.10.0
libtpu: 0.0.40
codegen_flags: <defaults>
</compile_context>

<pallas_src>
import math
import functools

import numpy as np
import jax
import jax.numpy as jnp
from jax.experimental import pallas as pl
from jax.experimental.pallas import tpu as pltpu


# ----------------------------------------------------------------------------
# glue helpers (mirror the PyTorch helper functions)
# ----------------------------------------------------------------------------
def temperature_range(n, cut):
    cut = cut + 1e-06
    log = math.log(cut)
    T1 = 1.0 / (math.pi * n ** 2 * log)
    T2 = 4.0 / (math.pi ** 3 * cut ** 2 * log)
    return T1, T2


def scalar_field_modes(n, m):
    """sqrt(1/Energy per mode) `e` (m,m) and sine modes `s` (n,m), float32."""
    x = jnp.linspace(0.0, 1.0, n, dtype=jnp.float32)
    k = jnp.arange(1, m + 1, dtype=jnp.float32)
    i = k[:, None]
    j = k[None, :]
    r = jnp.sqrt(i ** 2 + j ** 2)
    e = (r < m + 0.5).astype(jnp.float32) / r
    s = jnp.sin(math.pi * x[:, None] * k[None, :])
    return e, s


def _round_up(x, m):
    return (x + m - 1) // m * m


def _vmem_capacity_bytes():
    try:
        return int(pltpu.get_tpu_info().vmem_capacity_bytes)
    except Exception:
        pass
    # per-generation fallback: 64 MiB on v7x, 128 MiB on v5e/v6e
    try:
        kind = jax.devices()[0].device_kind.lower()
        if "v7" in kind:
            return 64 * 1024 * 1024
        return 128 * 1024 * 1024
    except Exception:
        return 64 * 1024 * 1024


# ----------------------------------------------------------------------------
# remap matrix build (plain JAX, one-time, tiny vs. the streaming matmul)
# ----------------------------------------------------------------------------
def _build_remap_matrix(dx, dy, n, p_pad, dtype):
    """Mt[q, p]: bilinear weight of source pixel q = i*n + j for output pixel p = r*n + c.

    Matches torch `remap(a, dx, dy, 'linear')` with meshgrid indexing='xy':
      x[r,c] = r, y[r,c] = c ;  xn = clip(r - dx), yn = clip(c - dy)
      out[r,c] = (1-yv)(1-xv) a[yf,xf] + (1-yv)xv a[yf,xc] + yv(1-xv) a[yc,xf] + yv xv a[yc,xc]
    """
    n2 = n * n
    nf = float(n - 1)
    idx = jnp.arange(n, dtype=jnp.float32)
    r = idx[:, None]                                  # output row
    c = idx[None, :]                                  # output col
    xn = jnp.clip(r - dx, 0.0, nf)                    # source column coordinate
    yn = jnp.clip(c - dy, 0.0, nf)                    # source row coordinate
    xf = jnp.floor(xn); xc = jnp.ceil(xn); xv = xn - xf
    yf = jnp.floor(yn); yc = jnp.ceil(yn); yv = yn - yf

    j = idx[None, None, :]
    col_w = (jnp.where(j == xf[..., None], 1.0 - xv[..., None], 0.0)
             + jnp.where(j == xc[..., None], xv[..., None], 0.0))     # (r, c, j)
    i = idx[None, None, :]
    row_w = (jnp.where(i == yf[..., None], 1.0 - yv[..., None], 0.0)
             + jnp.where(i == yc[..., None], yv[..., None], 0.0))     # (r, c, i)

    mt = jnp.einsum('rci,rcj->ijrc', row_w, col_w).reshape(n2, n2)    # (q, p)
    if p_pad != n2:
        mt = jnp.pad(mt, ((0, 0), (0, p_pad - n2)))   # lane-dense output (zero weight cols)
    return mt.astype(dtype)


# ----------------------------------------------------------------------------
# Pallas kernel: streaming MXU matmul  out[bc, p] = sum_q img[bc, q] * Mt[q, p]
# ----------------------------------------------------------------------------
def _remap_matmul_kernel(img_ref, mt_ref, o_ref, *, compute_dtype):
    x = img_ref[...].astype(compute_dtype)            # cast AFTER the tile DMA (native-dtype HBM)
    o_ref[...] = jnp.dot(x, mt_ref[...],
                         preferred_element_type=jnp.float32).astype(o_ref.dtype)


@functools.partial(jax.jit, static_argnames=("compute_dtype",))
def diffeo_remap_pallas(img, s, cu_scaled, cv_scaled, *, compute_dtype=jnp.float32):
    """img: (..., n, n); s: (n, m) sine modes; cu/cv: (m, m) coeffs * sqrt(T)*n."""
    n = img.shape[-1]
    assert img.shape[-2] == n, "Image(s) should be square."
    n2 = n * n
    out_dtype = jnp.promote_types(img.dtype, jnp.float32)   # PyTorch promotion semantics

    lead = img.shape[:-2]
    bc = 1
    for d in lead:
        bc *= int(d)
    img_flat = img.reshape(bc, n2)                    # native dtype, no cast / no pad

    # dx[r, c] = sum_ij cu[i, j] * s[c, i] * s[r, j]  ==  (s @ cu^T @ s^T)[r, c]
    s32 = s.astype(jnp.float32)
    dx = (s32 @ cu_scaled.astype(jnp.float32).T) @ s32.T          # (n, n)
    dy = (s32 @ cv_scaled.astype(jnp.float32).T) @ s32.T          # (n, n)

    p_pad = _round_up(n2, 128)                        # lane-dense output axis
    mt = _build_remap_matrix(dx, dy, n, p_pad, compute_dtype)     # (n2, p_pad)

    vmem_cap = _vmem_capacity_bytes()
    img_esize = np.dtype(img.dtype).itemsize
    mt_esize = np.dtype(compute_dtype).itemsize
    out_esize = np.dtype(out_dtype).itemsize

    # --- batch/channel tile (sublane-aligned; ragged last tile handled by Pallas masking) ---
    sub = max(8, 32 // max(1, img_esize))             # 8 for f32, 16 for bf16, 32 for int8
    if n2 <= 1024 and bc >= 512:
        tm = 512
    elif bc >= 256:
        tm = 256
    elif bc >= 128:
        tm = 128
    else:
        tm = _round_up(max(bc, 1), sub)
    # keep the double-buffered image tiles (+ in-kernel f32 copy) under ~30% of VMEM
    while tm >= 2 * sub and tm * n2 * (2 * img_esize + 4) > int(0.30 * vmem_cap):
        tm //= 2
    tm = max(int(tm), sub)

    # --- output-pixel tile: biggest 128-multiple whose double-buffered Mt slab fits ~40% of VMEM ---
    mt_budget = int(0.40 * vmem_cap)
    tp_cap = max(128, (mt_budget // max(1, 2 * n2 * mt_esize)) // 128 * 128)
    tp = int(min(p_pad, tp_cap))

    grid = (pl.cdiv(p_pad, tp), pl.cdiv(bc, tm))      # p outer (Mt slab resident over inner bc loop)

    # Working set: Mt slabs + img/out tiles (double-buffered) + cast/acc temporaries + headroom.
    est = (2 * n2 * tp * mt_esize
           + 2 * tm * n2 * img_esize
           + 2 * tm * tp * out_esize
           + tm * n2 * 4 + tm * tp * 4
           + (8 << 20))
    vmem_limit = int(min(vmem_cap, max(est, 32 << 20)))

    kernel = functools.partial(_remap_matmul_kernel, compute_dtype=compute_dtype)
    out_flat = pl.pallas_call(
        kernel,
        out_shape=jax.ShapeDtypeStruct((bc, p_pad), out_dtype),
        grid_spec=pltpu.PrefetchScalarGridSpec(
            num_scalar_prefetch=0,
            grid=grid,
            in_specs=[
                pl.BlockSpec((tm, n2), lambda pi, bi: (bi, 0)),   # image tile (pipelined)
                pl.BlockSpec((n2, tp), lambda pi, bi: (0, pi)),   # remap-matrix slab (resident per pi)
            ],
            out_specs=pl.BlockSpec((tm, tp), lambda pi, bi: (bi, pi)),
        ),
        compiler_params=pltpu.CompilerParams(
            dimension_semantics=("parallel", "parallel"),   # no carried state -> both TCs on v7x
            vmem_limit_bytes=vmem_limit,
        ),
    )(img_flat, mt)

    if p_pad != n2:
        out_flat = out_flat[:, :n2]
    return out_flat.reshape(img.shape[:-2] + (n, n))


# ----------------------------------------------------------------------------
# Diffeo module equivalent
# ----------------------------------------------------------------------------
class DiffeoPallas:
    def __init__(self, sT, rT, scut, rcut, cut_min, cut_max, alpha, stochastic=False,
                 compute_dtype=jnp.float32):
        self.sT, self.rT = sT, rT
        self.scut, self.rcut = scut, rcut
        self.cutmin, self.cutmax = cut_min, cut_max
        self.alpha = alpha
        self.stochastic = stochastic
        self.compute_dtype = compute_dtype   # jnp.bfloat16 for ~4x MXU if accuracy budget allows
        if stochastic:
            self.cutmax_max = cut_max
            self.alpha_max = alpha
        # Beta(sT - sT/(rT+1), sT/(rT+1)) etc., as in the PyTorch module
        self._aT = sT - sT / (rT + 1)
        self._bT = sT / (rT + 1)
        self._ac = scut - scut / (rcut + 1)
        self._bc = scut / (rcut + 1)

    def __call__(self, img, seed=0):
        init_shape = img.shape
        if img.ndim < 4:
            img = img[None, ...]   # 'c h w -> () c h w'
        n = img.shape[-1]

        # Host-side RNG for shape-defining / scalar draws: no device<->host syncs.
        rng = np.random.default_rng(seed)
        if self.stochastic:
            # NOTE: mutates self.cutmax like the torch module (not thread/vmap safe).
            self.cutmax = int(rng.integers(low=self.cutmin + 1, high=self.cutmax_max + 1))
        cut = int(rng.beta(self._ac, self._bc) * (self.cutmax + 1 - self.cutmin) + self.cutmin)
        T1, T2 = temperature_range(n, cut)
        T2 = max(T1, self.alpha * T2)
        T = float(rng.beta(self._aT, self._bT)) * (T2 - T1) + T1

        e, s = scalar_field_modes(n, cut)
        ku, kv = jax.random.split(jax.random.PRNGKey(seed), 2)
        cu = jax.random.normal(ku, (cut, cut), dtype=jnp.float32) * e
        cv = jax.random.normal(kv, (cut, cut), dtype=jnp.float32) * e
        scale = (T ** 0.5) * n

        # stash for the reference check in __main__
        self._last_s = s
        self._last_cu = scale * cu
        self._last_cv = scale * cv

        out = diffeo_remap_pallas(img, s, scale * cu, scale * cv,
                                  compute_dtype=self.compute_dtype)
        return out.reshape(init_shape)


# ----------------------------------------------------------------------------
# pure-JAX reference (mirrors torch `remap(..., interp='linear')`)
# ----------------------------------------------------------------------------
def _remap_ref(a, dx, dy):
    n = a.shape[-1]
    vals = jnp.arange(n, dtype=jnp.float32)
    y = jnp.broadcast_to(vals[None, :], (n, n))   # y[r, c] = c   (meshgrid 'xy')
    x = jnp.broadcast_to(vals[:, None], (n, n))   # x[r, c] = r
    xn = jnp.clip(x - dx, 0, n - 1)
    yn = jnp.clip(y - dy, 0, n - 1)
    xf = jnp.floor(xn).astype(jnp.int32)
    xc = jnp.ceil(xn).astype(jnp.int32)
    yf = jnp.floor(yn).astype(jnp.int32)
    yc = jnp.ceil(yn).astype(jnp.int32)
    xv = xn - xf
    yv = yn - yf
    return ((1 - yv) * (1 - xv) * a[..., yf, xf] + (1 - yv) * xv * a[..., yf, xc]
            + yv * (1 - xv) * a[..., yc, xf] + yv * xv * a[..., yc, xc])


if __name__ == "__main__":
    key = jax.random.PRNGKey(0)
    x = jax.random.uniform(key, (2, 4, 16, 16), dtype=jnp.float32)

    diffeo = DiffeoPallas(sT=4.0, rT=1.0, scut=4.0, rcut=1.0,
                          cut_min=2, cut_max=5, alpha=1.0)
    out = diffeo(x, seed=0)
    out = jax.block_until_ready(out)

    # sanity check against a plain-JAX reference of remap/scalar_field
    s = diffeo._last_s
    dx = jnp.einsum('ij,xi,yj->yx', diffeo._last_cu, s, s)
    dy = jnp.einsum('ij,xi,yj->yx', diffeo._last_cv, s, s)
    ref = _remap_ref(x, dx, dy)

    assert out.shape == x.shape and out.dtype == x.dtype
    err = float(jnp.max(jnp.abs(out - ref)))
    assert err < 1e-3, f"max abs err {err}"
    print("KERNEL_OK")
</pallas_src>

<mosaic_0001>
module attributes {stable_mosaic.version = 11 : i64} {
  func.func @_remap_matmul_kernel(%arg0: i32, %arg1: i32, %arg2: memref<8x256xf32, #tpu.memory_space<vmem>>, %arg3: memref<256x256xf32, #tpu.memory_space<vmem>>, %arg4: memref<8x256xf32, #tpu.memory_space<vmem>>) attributes {dimension_semantics = [#tpu.dimension_semantics<parallel>, #tpu.dimension_semantics<parallel>], iteration_bounds = array<i64: 1, 1>, scalar_prefetch = 0 : i64, scratch_operands = 0 : i64, tpu.core_type = #tpu.core_type<tc>, window_params = [{transform_indices = @transform_0, window_bounds = array<i64: 8, 256>}, {transform_indices = @transform_1, window_bounds = array<i64: 256, 256>}, {transform_indices = @transform_2, window_bounds = array<i64: 8, 256>}]} {
    %c0 = arith.constant 0 : index
    %c0_0 = arith.constant 0 : index
    %0 = vector.load %arg2[%c0, %c0_0] : memref<8x256xf32, #tpu.memory_space<vmem>>, vector<8x256xf32>
    %c0_1 = arith.constant 0 : index
    %c0_2 = arith.constant 0 : index
    %1 = vector.load %arg3[%c0_1, %c0_2] : memref<256x256xf32, #tpu.memory_space<vmem>>, vector<256x256xf32>
    %cst = arith.constant dense<0.000000e+00> : vector<8x256xf32>
    %2 = tpu.matmul %0, %1, %cst {dimension_numbers = #tpu.dot_dimension_numbers<[1], [0], [0], [1], [0, 0, 1, 1], [], []>} : vector<8x256xf32>, vector<256x256xf32>, vector<8x256xf32> -> vector<8x256xf32>
    %c0_3 = arith.constant 0 : index
    %c0_4 = arith.constant 0 : index
    %3 = vector.load %arg4[%c0_3, %c0_4] : memref<8x256xf32, #tpu.memory_space<vmem>>, vector<8x256xf32>
    tpu.vector_store %arg4[%c0_3, %c0_4], %2 {strides = array<i32>} : memref<8x256xf32, #tpu.memory_space<vmem>>, vector<8x256xf32>,
    return
  }
  func.func @transform_0(%arg0: i32, %arg1: i32) -> (i32, i32) {
    %c0_i32 = arith.constant 0 : i32
    %c0_i32_0 = arith.constant 0 : i32
    return %arg1, %c0_i32 : i32, i32
  }
  func.func @transform_1(%arg0: i32, %arg1: i32) -> (i32, i32) {
    %c0_i32 = arith.constant 0 : i32
    %c0_i32_0 = arith.constant 0 : i32
    return %c0_i32, %arg0 : i32, i32
  }
  func.func @transform_2(%arg0: i32, %arg1: i32) -> (i32, i32) {
    %c0_i32 = arith.constant 0 : i32
    return %arg1, %arg0 : i32, i32
  }
}

</mosaic_0001>

<bundles_post_ra>
// kernel: diffeo_remap_pallas.1
= control target key start
LH: loop header
LB: loop body
LE: loop exit
PB: predicated region body
PF: predicated region fallthrough
CT: control target
= control target key end

     0   :  { %s437_s1 = inlined_call_operand.vmem [shape: f32[256,256], index: 1, kind: input, shape index: {}]   ;;  %s438_s0 = inlined_call_operand.vmem [shape: f32[8,256], index: 0, kind: input, shape index: {}]   ;;  %s439_s2 = inlined_call_operand.vmem [shape: f32[8,256], index: 2, kind: output, shape index: {}]  }
   0x1   :  { %v14_v0 = vld [vmem:[%s437_s1 + $0x8] sm:$0xff]  ;;  %v16_v1 = vld [vmem:[%s437_s1 + $0x18] sm:$0xff]  ;;  %v13_v2 = vld [vmem:[%s437_s1] sm:$0xff] }
   0x2   :  { %v154_v3 = vpack.c.bf16 %v16_v1, %v14_v0  ;;  %v15_v4 = vld [vmem:[%s437_s1 + $0x10] sm:$0xff]  ;;  %v18_v5 = vld [vmem:[%s437_s1 + $0x28] sm:$0xff]  ;;  %v20_v6 = vld [vmem:[%s437_s1 + $0x38] sm:$0xff] }
   0x3   :  { %v156_v7 = vpack.c.bf16 %v15_v4, %v13_v2  ;;  %v158_v8 = vpack.c.bf16 %v20_v6, %v18_v5  ;;  %v17_v9 = vld [vmem:[%s437_s1 + $0x20] sm:$0xff]  ;;  %v19_v10 = vld [vmem:[%s437_s1 + $0x30] sm:$0xff]  ;;  %v22_v11 = vld [vmem:[%s437_s1 + $0x48] sm:$0xff] }
   0x4   :  { %155 = vmatprep.subr.bf16.mxu0 %v154_v3  ;;  %v24_v12 = vld [vmem:[%s437_s1 + $0x58] sm:$0xff]  ;;  %v160_v13 = vpack.c.bf16 %v19_v10, %v17_v9  ;;  %v21_v15 = vld [vmem:[%s437_s1 + $0x40] sm:$0xff]  ;;  %v23_v16 = vld [vmem:[%s437_s1 + $0x50] sm:$0xff] }
   0x5   :  { %157 = vmatpush1.bf16.msra.mxu0 %v156_v7  ;;  %v162_v14 = vpack.c.bf16 %v24_v12, %v22_v11  ;;  %v26_v17 = vld [vmem:[%s437_s1 + $0x68] sm:$0xff]  ;;  %v28_v18 = vld [vmem:[%s437_s1 + $0x78] sm:$0xff]  ;;  %v164_v19 = vpack.c.bf16 %v23_v16, %v21_v15  ;;  %v25_v21 = vld [vmem:[%s437_s1 + $0x60] sm:$0xff] }
   0x6   :  { %159 = vmatprep.subr.bf16.mxu0 %v158_v8  ;;  %v166_v20 = vpack.c.bf16 %v28_v18, %v26_v17  ;;  %v27_v22 = vld [vmem:[%s437_s1 + $0x70] sm:$0xff]  ;;  %v30_v23 = vld [vmem:[%s437_s1 + $0x88] sm:$0xff]  ;;  %v32_v24 = vld [vmem:[%s437_s1 + $0x98] sm:$0xff] }
   0x7   :  { %v168_v25 = vpack.c.bf16 %v27_v22, %v25_v21  ;;  %v170_v26 = vpack.c.bf16 %v32_v24, %v30_v23  ;;  %v29_v27 = vld [vmem:[%s437_s1 + $0x80] sm:$0xff]  ;;  %v31_v28 = vld [vmem:[%s437_s1 + $0x90] sm:$0xff]  ;;  %v34_v29 = vld [vmem:[%s437_s1 + $0xa8] sm:$0xff] }
   0x8   :  { %v36_v30 = vld [vmem:[%s437_s1 + $0xb8] sm:$0xff]  ;;  %v172_v31 = vpack.c.bf16 %v31_v28, %v29_v27  ;;  %v33_v33 = vld [vmem:[%s437_s1 + $0xa0] sm:$0xff]  ;;  %v35_v34 = vld [vmem:[%s437_s1 + $0xb0] sm:$0xff] }
   0x9   :  { %161 = vmatpush1.bf16.msra.mxu0 %v160_v13  ;;  %v174_v32 = vpack.c.bf16 %v36_v30, %v34_v29  ;;  %v38_v35 = vld [vmem:[%s437_s1 + $0xc8] sm:$0xff]  ;;  %v40_v36 = vld [vmem:[%s437_s1 + $0xd8] sm:$0xff]  ;;  %v176_v37 = vpack.c.bf16 %v35_v34, %v33_v33  ;;  %v37_v39 = vld [vmem:[%s437_s1 + $0xc0] sm:$0xff] }
   0xa   :  { %163 = vmatprep.subr.bf16.mxu0 %v162_v14  ;;  %v178_v38 = vpack.c.bf16 %v40_v36, %v38_v35  ;;  %v39_v40 = vld [vmem:[%s437_s1 + $0xd0] sm:$0xff]  ;;  %v12_v41 = vld [vmem:[%s438_s0 + $0x8] sm:$0xff]  ;;  %v44_v43 = vld [vmem:[%s437_s1 + $0xf8] sm:$0xff] }
   0xb   :  { %v42_v42 = vld [vmem:[%s437_s1 + $0xe8] sm:$0xff]  ;;  %141 = vmatprep.mubr.f32.mxu0 %v12_v41  ;;  %v180_v44 = vpack.c.bf16 %v39_v40, %v37_v39  ;;  %v41_v46 = vld [vmem:[%s437_s1 + $0xe0] sm:$0xff]  ;;  %v43_v47 = vld [vmem:[%s437_s1 + $0xf0] sm:$0xff] }
   0xc   :  { %v182_v45 = vpack.c.bf16 %v44_v43, %v42_v42  ;;  %v46_v48 = vld [vmem:[%s437_s1 + $0x108] sm:$0xff]  ;;  %v48_v49 = vld [vmem:[%s437_s1 + $0x118] sm:$0xff]  ;;  %v184_v50 = vpack.c.bf16 %v43_v47, %v41_v46  ;;  %v45_v52 = vld [vmem:[%s437_s1 + $0x100] sm:$0xff] }
   0xd   :  { %165 = vmatpush1.bf16.msra.mxu0 %v164_v19  ;;  %v186_v51 = vpack.c.bf16 %v48_v49, %v46_v48  ;;  %v47_v53 = vld [vmem:[%s437_s1 + $0x110] sm:$0xff]  ;;  %v50_v54 = vld [vmem:[%s437_s1 + $0x128] sm:$0xff]  ;;  %v52_v55 = vld [vmem:[%s437_s1 + $0x138] sm:$0xff] }
   0xe   :  { %167 = vmatprep.subr.bf16.mxu0 %v166_v20  ;;  %v188_v56 = vpack.c.bf16 %v47_v53, %v45_v52  ;;  %v190_v57 = vpack.c.bf16 %v52_v55, %v50_v54  ;;  %v49_v58 = vld [vmem:[%s437_s1 + $0x120] sm:$0xff]  ;;  %v51_v59 = vld [vmem:[%s437_s1 + $0x130] sm:$0xff]  ;;  %v54_v60 = vld [vmem:[%s437_s1 + $0x148] sm:$0xff] }
   0xf   :  { %v56_v61 = vld [vmem:[%s437_s1 + $0x158] sm:$0xff]  ;;  %v192_v62 = vpack.c.bf16 %v51_v59, %v49_v58  ;;  %v53_v0 = vld [vmem:[%s437_s1 + $0x140] sm:$0xff]  ;;  %v55_v1 = vld [vmem:[%s437_s1 + $0x150] sm:$0xff] }
  0x10   :  { %v194_v63 = vpack.c.bf16 %v56_v61, %v54_v60  ;;  %v58_v2 = vld [vmem:[%s437_s1 + $0x168] sm:$0xff]  ;;  %v60_v3 = vld [vmem:[%s437_s1 + $0x178] sm:$0xff]  ;;  %v196_v4 = vpack.c.bf16 %v55_v1, %v53_v0  ;;  %v57_v6 = vld [vmem:[%s437_s1 + $0x160] sm:$0xff] }
  0x11   :  { %169 = vmatpush1.bf16.msra.mxu0 %v168_v25  ;;  %v198_v5 = vpack.c.bf16 %v60_v3, %v58_v2  ;;  %v59_v7 = vld [vmem:[%s437_s1 + $0x170] sm:$0xff]  ;;  %v62_v8 = vld [vmem:[%s437_s1 + $0x188] sm:$0xff]  ;;  %v64_v9 = vld [vmem:[%s437_s1 + $0x198] sm:$0xff] }
  0x12   :  { %171 = vmatprep.subr.bf16.mxu0 %v170_v26  ;;  %v200_v10 = vpack.c.bf16 %v59_v7, %v57_v6  ;;  %v202_v11 = vpack.c.bf16 %v64_v9, %v62_v8  ;;  %v61_v12 = vld [vmem:[%s437_s1 + $0x180] sm:$0xff]  ;;  %v63_v13 = vld [vmem:[%s437_s1 + $0x190] sm:$0xff]  ;;  %v66_v14 = vld [vmem:[%s437_s1 + $0x1a8] sm:$0xff] }
  0x13   :  { %v68_v15 = vld [vmem:[%s437_s1 + $0x1b8] sm:$0xff]  ;;  %v204_v16 = vpack.c.bf16 %v63_v13, %v61_v12  ;;  %v65_v18 = vld [vmem:[%s437_s1 + $0x1a0] sm:$0xff]  ;;  %v67_v19 = vld [vmem:[%s437_s1 + $0x1b0] sm:$0xff] }
  0x14   :  { %v206_v17 = vpack.c.bf16 %v68_v15, %v66_v14  ;;  %v70_v20 = vld [vmem:[%s437_s1 + $0x1c8] sm:$0xff]  ;;  %v72_v21 = vld [vmem:[%s437_s1 + $0x1d8] sm:$0xff]  ;;  %v208_v22 = vpack.c.bf16 %v67_v19, %v65_v18  ;;  %v69_v24 = vld [vmem:[%s437_s1 + $0x1c0] sm:$0xff] }
  0x15   :  { %173 = vmatpush1.bf16.msra.mxu0 %v172_v31  ;;  %v210_v23 = vpack.c.bf16 %v72_v21, %v70_v20  ;;  %v71_v25 = vld [vmem:[%s437_s1 + $0x1d0] sm:$0xff]  ;;  %v74_v26 = vld [vmem:[%s437_s1 + $0x1e8] sm:$0xff]  ;;  %v76_v27 = vld [vmem:[%s437_s1 + $0x1f8] sm:$0xff] }
  0x16   :  { %175 = vmatprep.subr.bf16.mxu0 %v174_v32  ;;  %v212_v28 = vpack.c.bf16 %v71_v25, %v69_v24  ;;  %v214_v29 = vpack.c.bf16 %v76_v27, %v74_v26  ;;  %v73_v30 = vld [vmem:[%s437_s1 + $0x1e0] sm:$0xff]  ;;  %v75_v31 = vld [vmem:[%s437_s1 + $0x1f0] sm:$0xff] }
  0x17   :  { %v216_v32 = vpack.c.bf16 %v75_v31, %v73_v30  ;;  %v11_v33 = vld [vmem:[%s438_s0] sm:$0xff] }
  0x19   :  { %177 = vmatpush1.bf16.msra.mxu0 %v176_v37 }
  0x1a   :  { %179 = vmatprep.subr.bf16.mxu0 %v178_v38 }
  0x1d   :  { %181 = vmatpush1.bf16.msra.mxu0 %v180_v44 }
  0x1e   :  { %183 = vmatprep.subr.bf16.mxu0 %v182_v45 }
  0x21   :  { %185 = vmatpush1.bf16.msra.mxu0 %v184_v50 }
  0x22   :  { %187 = vmatprep.subr.bf16.mxu0 %v186_v51 }
  0x25   :  { %189 = vmatpush1.bf16.msra.mxu0 %v188_v56 }
  0x26   :  { %191 = vmatprep.subr.bf16.mxu0 %v190_v57 }
  0x29   :  { %193 = vmatpush1.bf16.msra.mxu0 %v192_v62 }
  0x2a   :  { %195 = vmatprep.subr.bf16.mxu0 %v194_v63 }
  0x2d   :  { %197 = vmatpush1.bf16.msra.mxu0 %v196_v4 }
  0x2e   :  { %199 = vmatprep.subr.bf16.mxu0 %v198_v5 }
  0x31   :  { %201 = vmatpush1.bf16.msra.mxu0 %v200_v10 }
  0x32   :  { %203 = vmatprep.subr.bf16.mxu0 %v202_v11 }
  0x35   :  { %205 = vmatpush1.bf16.msra.mxu0 %v204_v16 }
  0x36   :  { %207 = vmatprep.subr.bf16.mxu0 %v206_v17 }
  0x39   :  { %209 = vmatpush1.bf16.msra.mxu0 %v208_v22 }
  0x3a   :  { %211 = vmatprep.subr.bf16.mxu0 %v210_v23 }
  0x3d   :  { %213 = vmatpush1.bf16.msra.mxu0 %v212_v28 }
  0x3e   :  { %215 = vmatprep.subr.bf16.mxu0 %v214_v29 }
  0x41   :  { %217 = vmatpush1.bf16.msra.mxu0 %v216_v32 }
  0x44   :  { %142 = vmatmul.mubr.f32.vlgmr.msra.gmra.mrb[0].mxu0 %v11_v33 }
 0x117   :  { %v143_v34 = vpop.f32.mrb[0].mxu0 }
 0x118   :  { %148 = vst [vmem:[%s439_s2] sm:$0xff] %v143_v34  ;;  %v145_v35 = vpop.f32.mrb[1].mxu0 }
 0x119   :  { %149 = vst [vmem:[%s439_s2 + $0x8] sm:$0xff] %v145_v35 }

</bundles_post_ra>
